<compile_context>
chip_gen: v6e
topology: v6e:2x2x1
jax: 0.10.0
libtpu: 0.0.40
codegen_flags: <defaults>
</compile_context>

<pallas_src>
import functools

import jax
import jax.numpy as jnp
from jax.experimental import pallas as pl
from jax.experimental.pallas import tpu as pltpu


def _round_up(x, m):
    return ((x + m - 1) // m) * m


def _triplet_kernel(a_ref, p_ref, n_ref, vals_ref, idx_ref, *,
                    beta, m_true, num_k):
    k = pl.program_id(1)                  # M (reduction) axis, innermost
    tm = a_ref.shape[0]

    a = a_ref[...].astype(jnp.float32)
    p = p_ref[...].astype(jnp.float32)
    n = n_ref[...].astype(jnp.float32)

    dp = a - p
    dn = a - n
    # (a-p)^2 - (a-n)^2, factored (fewer VPU ops); beta added after reduction.
    d = (dp + dn) * (dp - dn)             # [tm, tn] f32

    # Block-local row ids (0..tm-1); global offset k*tm is added to the
    # [1, tn] block-argmax result instead of to the whole tile.
    local_ids = jax.lax.broadcasted_iota(jnp.int32, d.shape, 0)

    # Mask rows past the true M, only relevant on the tail M block.  This
    # whole branch disappears at trace time when M % tm == 0.
    tail_valid = m_true - (num_k - 1) * tm     # static Python int
    if tail_valid < tm:
        limit = jnp.where(k == num_k - 1, tail_valid, tm)   # scalar select
        d = jnp.where(local_ids < limit, d, -jnp.inf)

    blk_max = jnp.max(d, axis=0, keepdims=True)              # [1, tn]  (XLU)
    sentinel = jnp.int32(2**31 - 1)
    cand = jnp.where(d == blk_max, local_ids, sentinel)
    blk_idx = jnp.min(cand, axis=0, keepdims=True) + k * tm  # first hit, global

    @pl.when(k == 0)
    def _():
        vals_ref[...] = blk_max.astype(vals_ref.dtype)
        idx_ref[...] = blk_idx

    @pl.when(k > 0)
    def _():
        prev = vals_ref[...].astype(jnp.float32)
        better = blk_max > prev           # strict '>' keeps earliest index on ties
        vals_ref[...] = jnp.where(better, blk_max, prev).astype(vals_ref.dtype)
        idx_ref[...] = jnp.where(better, blk_idx, idx_ref[...])

    @pl.when(k == num_k - 1)
    def _():
        vals_ref[...] = (vals_ref[...].astype(jnp.float32) + beta).astype(vals_ref.dtype)


def triplet_loss(anchor, positive, negative, beta, *, tm=None, tn=None):
    M, N = anchor.shape
    itemsize = jnp.dtype(anchor.dtype).itemsize
    # Sublane packing: f32 -> 8, bf16 -> 16, int8/fp8 -> 32.
    sub = 8 * max(1, 4 // itemsize)

    # Default tiles: ~6 MiB of f32 input per grid step (x2 pipeline buffers =
    # 12 MiB) -- fits default scoped VMEM on v5e/v6e/v7x.  Keep >=2 N tiles
    # where possible so the "parallel" axis can shard across v7x's 2 TCs.
    if tn is None:
        tn = min(1024, _round_up(pl.cdiv(N, 2), 128), _round_up(N, 128))
    else:
        tn = min(_round_up(tn, 128), _round_up(N, 128))
    if tm is None:
        tm = min(512, _round_up(M, sub))
    else:
        tm = min(_round_up(tm, sub), _round_up(M, sub))

    grid_n = pl.cdiv(N, tn)
    grid_m = pl.cdiv(M, tm)
    grid = (grid_n, grid_m)               # N tiles (parallel), M tiles (arbitrary, last)

    kernel = functools.partial(_triplet_kernel, beta=float(beta),
                               m_true=M, num_k=grid_m)

    vals, idxs = pl.pallas_call(
        kernel,
        out_shape=(
            jax.ShapeDtypeStruct((1, N), anchor.dtype),
            jax.ShapeDtypeStruct((1, N), jnp.int32),
        ),
        grid=grid,
        in_specs=[
            pl.BlockSpec((tm, tn), lambda j, k: (k, j)),   # anchor
            pl.BlockSpec((tm, tn), lambda j, k: (k, j)),   # positive
            pl.BlockSpec((tm, tn), lambda j, k: (k, j)),   # negative
        ],
        out_specs=(
            pl.BlockSpec((1, tn), lambda j, k: (0, j)),    # values (resident over k)
            pl.BlockSpec((1, tn), lambda j, k: (0, j)),    # indices (resident over k)
        ),
        compiler_params=pltpu.CompilerParams(
            dimension_semantics=("parallel", "arbitrary")),
        cost_estimate=pl.CostEstimate(
            flops=7 * M * N,
            transcendentals=0,
            bytes_accessed=3 * M * N * itemsize + 8 * N),
    )(anchor, positive, negative)

    return vals[0], idxs[0]               # (values, indices), shapes [N]


if __name__ == "__main__":
    key = jax.random.PRNGKey(0)
    ka, kp, kn = jax.random.split(key, 3)

    M, N = 40, 384                        # reduction axis M, feature axis N
    beta = 0.5

    anchor = jax.random.normal(ka, (M, N), dtype=jnp.float32)
    positive = jax.random.normal(kp, (M, N), dtype=jnp.float32)
    negative = jax.random.normal(kn, (M, N), dtype=jnp.float32)

    # Plain-JAX reference matching the PyTorch formula.
    dist_ref = (anchor - positive) ** 2 - (anchor - negative) ** 2 + beta
    vals_ref = jnp.max(dist_ref, axis=0)
    idxs_ref = jnp.argmax(dist_ref, axis=0).astype(jnp.int32)

    # 1) Default tiling: single M block (no tail mask traced), 2 N tiles with
    #    a partial last N block (exercises unpadded column-tail handling).
    vals, idxs = triplet_loss(anchor, positive, negative, beta)
    jax.block_until_ready((vals, idxs))
    assert jnp.allclose(vals, vals_ref, atol=1e-5), "values mismatch (default tiles)"
    assert jnp.array_equal(idxs, idxs_ref), "indices mismatch (default tiles)"

    # 2) Small tiles: exercises the (parallel N, arbitrary M) grid, the running
    #    max/argmax accumulation in the resident output blocks across M blocks,
    #    and the trace-time-gated tail-row mask (M=40, tm=16 -> 8-row tail).
    vals2, idxs2 = triplet_loss(anchor, positive, negative, beta, tm=16, tn=128)
    jax.block_until_ready((vals2, idxs2))
    assert jnp.allclose(vals2, vals_ref, atol=1e-5), "values mismatch (tiled)"
    assert jnp.array_equal(idxs2, idxs_ref), "indices mismatch (tiled)"

    print("KERNEL_OK")
</pallas_src>

<mosaic_0001>
module attributes {stable_mosaic.version = 11 : i64} {
  func.func @_triplet_kernel(%arg0: i32, %arg1: i32, %arg2: memref<40x256xf32, #tpu.memory_space<vmem>>, %arg3: memref<40x256xf32, #tpu.memory_space<vmem>>, %arg4: memref<40x256xf32, #tpu.memory_space<vmem>>, %arg5: memref<1x256xf32, #tpu.memory_space<vmem>>, %arg6: memref<1x256xi32, #tpu.memory_space<vmem>>) attributes {dimension_semantics = [#tpu.dimension_semantics<parallel>, #tpu.dimension_semantics<arbitrary>], iteration_bounds = array<i64: 2, 1>, scalar_prefetch = 0 : i64, scratch_operands = 0 : i64, tpu.core_type = #tpu.core_type<tc>, window_params = [{transform_indices = @transform_0, window_bounds = array<i64: 40, 256>}, {transform_indices = @transform_1, window_bounds = array<i64: 40, 256>}, {transform_indices = @transform_2, window_bounds = array<i64: 40, 256>}, {transform_indices = @transform_3, window_bounds = array<i64: 1, 256>}, {transform_indices = @transform_4, window_bounds = array<i64: 1, 256>}]} {
    %c0 = arith.constant 0 : index
    %c0_0 = arith.constant 0 : index
    %0 = vector.load %arg2[%c0, %c0_0] : memref<40x256xf32, #tpu.memory_space<vmem>>, vector<40x256xf32>
    %c0_1 = arith.constant 0 : index
    %c0_2 = arith.constant 0 : index
    %1 = vector.load %arg3[%c0_1, %c0_2] : memref<40x256xf32, #tpu.memory_space<vmem>>, vector<40x256xf32>
    %c0_3 = arith.constant 0 : index
    %c0_4 = arith.constant 0 : index
    %2 = vector.load %arg4[%c0_3, %c0_4] : memref<40x256xf32, #tpu.memory_space<vmem>>, vector<40x256xf32>
    %3 = arith.subf %0, %1 : vector<40x256xf32>
    %4 = arith.subf %0, %2 : vector<40x256xf32>
    %5 = arith.addf %3, %4 : vector<40x256xf32>
    %6 = arith.subf %3, %4 : vector<40x256xf32>
    %7 = arith.mulf %5, %6 : vector<40x256xf32>
    %8 = tpu.iota {dimensions = array<i32: 0>} : vector<40x256xi32>
    %cst = arith.constant dense<0xFF800000> : vector<256xf32>
    %9 = vector.multi_reduction <maximumf>, %7, %cst [0] : vector<40x256xf32> to vector<256xf32>
    %10 = vector.shape_cast %9 : vector<256xf32> to vector<1x256xf32>
    %11 = vector.broadcast %10 : vector<1x256xf32> to vector<40x256xf32>
    %12 = arith.cmpf oeq, %7, %11 : vector<40x256xf32>
    %c2147483647_i32 = arith.constant 2147483647 : i32
    %13 = vector.broadcast %c2147483647_i32 : i32 to vector<40x256xi32>
    %14 = arith.select %12, %8, %13 : vector<40x256xi1>, vector<40x256xi32>
    %cst_5 = arith.constant dense<2147483647> : vector<256xi32>
    %15 = vector.multi_reduction <minsi>, %14, %cst_5 [0] : vector<40x256xi32> to vector<256xi32>
    %16 = vector.shape_cast %15 : vector<256xi32> to vector<1x256xi32>
    %c40_i32 = arith.constant 40 : i32
    %17 = arith.muli %arg1, %c40_i32 : i32
    %18 = vector.broadcast %17 : i32 to vector<1x256xi32>
    %19 = arith.addi %16, %18 : vector<1x256xi32>
    %c0_i32 = arith.constant 0 : i32
    %20 = arith.cmpi eq, %arg1, %c0_i32 : i32
    %21 = arith.extui %20 : i1 to i32
    %c0_i32_6 = arith.constant 0 : i32
    %22 = arith.cmpi ne, %21, %c0_i32_6 : i32
    scf.if %22 {
      %c0_11 = arith.constant 0 : index
      %c0_12 = arith.constant 0 : index
      %29 = vector.load %arg5[%c0_11, %c0_12] : memref<1x256xf32, #tpu.memory_space<vmem>>, vector<1x256xf32>
      tpu.vector_store %arg5[%c0_11, %c0_12], %10 {strides = array<i32>} : memref<1x256xf32, #tpu.memory_space<vmem>>, vector<1x256xf32>,
      %c0_13 = arith.constant 0 : index
      %c0_14 = arith.constant 0 : index
      %30 = vector.load %arg6[%c0_13, %c0_14] : memref<1x256xi32, #tpu.memory_space<vmem>>, vector<1x256xi32>
      tpu.vector_store %arg6[%c0_13, %c0_14], %19 {strides = array<i32>} : memref<1x256xi32, #tpu.memory_space<vmem>>, vector<1x256xi32>,
    } else {
    }
    %c0_i32_7 = arith.constant 0 : i32
    %23 = arith.cmpi sgt, %arg1, %c0_i32_7 : i32
    %24 = arith.extui %23 : i1 to i32
    %c0_i32_8 = arith.constant 0 : i32
    %25 = arith.cmpi ne, %24, %c0_i32_8 : i32
    scf.if %25 {
      %c0_11 = arith.constant 0 : index
      %c0_12 = arith.constant 0 : index
      %29 = vector.load %arg5[%c0_11, %c0_12] : memref<1x256xf32, #tpu.memory_space<vmem>>, vector<1x256xf32>
      %30 = arith.cmpf ogt, %10, %29 : vector<1x256xf32>
      %31 = arith.select %30, %10, %29 : vector<1x256xi1>, vector<1x256xf32>
      %c0_13 = arith.constant 0 : index
      %c0_14 = arith.constant 0 : index
      %32 = vector.load %arg5[%c0_13, %c0_14] : memref<1x256xf32, #tpu.memory_space<vmem>>, vector<1x256xf32>
      tpu.vector_store %arg5[%c0_13, %c0_14], %31 {strides = array<i32>} : memref<1x256xf32, #tpu.memory_space<vmem>>, vector<1x256xf32>,
      %c0_15 = arith.constant 0 : index
      %c0_16 = arith.constant 0 : index
      %33 = vector.load %arg6[%c0_15, %c0_16] : memref<1x256xi32, #tpu.memory_space<vmem>>, vector<1x256xi32>
      %34 = arith.select %30, %19, %33 : vector<1x256xi1>, vector<1x256xi32>
      %c0_17 = arith.constant 0 : index
      %c0_18 = arith.constant 0 : index
      %35 = vector.load %arg6[%c0_17, %c0_18] : memref<1x256xi32, #tpu.memory_space<vmem>>, vector<1x256xi32>
      tpu.vector_store %arg6[%c0_17, %c0_18], %34 {strides = array<i32>} : memref<1x256xi32, #tpu.memory_space<vmem>>, vector<1x256xi32>,
    } else {
    }
    %c0_i32_9 = arith.constant 0 : i32
    %26 = arith.cmpi eq, %arg1, %c0_i32_9 : i32
    %27 = arith.extui %26 : i1 to i32
    %c0_i32_10 = arith.constant 0 : i32
    %28 = arith.cmpi ne, %27, %c0_i32_10 : i32
    scf.if %28 {
      %c0_11 = arith.constant 0 : index
      %c0_12 = arith.constant 0 : index
      %29 = vector.load %arg5[%c0_11, %c0_12] : memref<1x256xf32, #tpu.memory_space<vmem>>, vector<1x256xf32>
      %cst_13 = arith.constant 5.000000e-01 : f32
      %30 = vector.broadcast %cst_13 : f32 to vector<1x256xf32>
      %31 = arith.addf %29, %30 : vector<1x256xf32>
      %c0_14 = arith.constant 0 : index
      %c0_15 = arith.constant 0 : index
      %32 = vector.load %arg5[%c0_14, %c0_15] : memref<1x256xf32, #tpu.memory_space<vmem>>, vector<1x256xf32>
      tpu.vector_store %arg5[%c0_14, %c0_15], %31 {strides = array<i32>} : memref<1x256xf32, #tpu.memory_space<vmem>>, vector<1x256xf32>,
    } else {
    }
    return
  }
  func.func @transform_0(%arg0: i32, %arg1: i32) -> (i32, i32) {
    %c0_i32 = arith.constant 0 : i32
    return %arg1, %arg0 : i32, i32
  }
  func.func @transform_1(%arg0: i32, %arg1: i32) -> (i32, i32) {
    %c0_i32 = arith.constant 0 : i32
    return %arg1, %arg0 : i32, i32
  }
  func.func @transform_2(%arg0: i32, %arg1: i32) -> (i32, i32) {
    %c0_i32 = arith.constant 0 : i32
    return %arg1, %arg0 : i32, i32
  }
  func.func @transform_3(%arg0: i32, %arg1: i32) -> (i32, i32) {
    %c0_i32 = arith.constant 0 : i32
    %c0_i32_0 = arith.constant 0 : i32
    return %c0_i32, %arg0 : i32, i32
  }
  func.func @transform_4(%arg0: i32, %arg1: i32) -> (i32, i32) {
    %c0_i32 = arith.constant 0 : i32
    %c0_i32_0 = arith.constant 0 : i32
    return %c0_i32, %arg0 : i32, i32
  }
}

</mosaic_0001>

<bundles_post_ra>
// kernel: tpu_custom_call.1
= control target key start
LH: loop header
LB: loop body
LE: loop exit
PB: predicated region body
PF: predicated region fallthrough
CT: control target
= control target key end

     0   :  { %10 = vsyncpa [#allocation3], 0  ;;  %s1504_s0 = inlined_call_operand.hbm [shape: f32[40,384], index: 0, kind: input, shape index: {}]   ;;  %s1505_s1 = inlined_call_operand.hbm [shape: f32[40,384], index: 1, kind: input, shape index: {}]   ;;  %s1506_s2 = inlined_call_operand.hbm [shape: f32[40,384], index: 2, kind: input, shape index: {}]   ;;  %s1507_s3 = inlined_call_operand.hbm [shape: f32[1,384], index: 3, kind: output, shape index: {0}]   ;;  %s1508_s4 = inlined_call_operand.hbm [shape: s32[1,384], index: 4, kind: output, shape index: {1}]  }
   0x1   :  { %12 = vsyncpa [#allocation3 + $0x1], 0 }
   0x2   :  { %13 = vsyncpa [#allocation6], 0 }
   0x3   :  { %15 = vsyncpa [#allocation6 + $0x1], 0 }
   0x4   :  { %16 = vsyncpa [#allocation4], 0 }
   0x5   :  { %18 = vsyncpa [#allocation4 + $0x1], 0 }
   0x6   :  { %19 = vsyncpa [#allocation10], 0 }
   0x7   :  { %21 = vsyncpa [#allocation10 + $0x1], 0  ;;  %s1218_s15 = smov 0   ;;  %s1220_s16 = smov 0  }
   0x8   :  { %s1222_s17 = smov 0   ;;  %s1224_s18 = smov 0  }
   0x9   :  { %s1226_s19 = smov 0   ;;  %s1228_s20 = smov 0  }
   0xa LB: > { %s1249_s21 = sadd.s32 4294967295, %s1179_s20   ;;  %s874_s22 = sadd.s32 4294967294, %s1179_s20   ;;  %s1179_s20 = sphi %s1228_s20, %s27_s20   ;;  %s1175_s19 = sphi %s1226_s19, %s1526_s19   ;;  %s1171_s18 = sphi %s1224_s18, %s1525_s18   ;;  %s1167_s17 = sphi %s1222_s17, %s1524_s17   ;;  %s1163_s16 = sphi %s1220_s16, %s1523_s16   ;;  %s1159_s15 = sphi %s1218_s15, %s1522_s15  }
   0xb   : > { %s39_s23 = sadd.s32 1, %s1175_s19  ;;  %s48_s24 = sadd.s32 1, %s1167_s17 }
   0xc   : > { %p41_p0 = scmp.ge.s32.totalorder %s39_s23, 2  ;;  %p55_p1 = scmp.ne.s32.totalorder %s1167_s17, %s1163_s16 }
   0xd   : > { %p56_p2 = scmp.eq.s32.totalorder %s1179_s20, 0  ;;  %p61_p3 = scmp.ne.s32.totalorder %s1163_s16, %s1159_s15 }
   0xe   : > { %s1528_s23 = smov (%p41_p0, %s39_s23), 0  ;;  %p62_p5 = scmp.eq.s32.totalorder %s1249_s21, 0 }
   0xf   : > { %1511 = sst [smem:[#allocation15_spill]] %s1528_s23  ;;  %p1261_p4 = por %p56_p2, %p55_p1 }
  0x10   : > { %s44_s26 = ssub.s32 %s1175_s19, %s1528_s23  ;;  %p141_p6 = scmp.eq.s32.totalorder %s1249_s21, 1 }
  0x11   : > { %p46_p7 = scmp.eq.s32.totalorder %s44_s26, 0  ;;  %p1269_p8 = por %p62_p5, %p61_p3 }
  0x12   : > { %p1273_p9 = por %p141_p6, %p55_p1  ;;  %p147_p10 = scmp.eq.s32.totalorder %s874_s22, 1 }
  0x13   : > { %s1278_s29 = scalar_select %p46_p7, %s1167_s17, %s48_s24  }
  0x14   : > { %p1280_p11 = por %p147_p10, %p61_p3  ;;  %p1510_p12 = scmp.ge.s32.totalorder %s1179_s20, 2 }
  0x15   : > { %1515 = sst [smem:[#allocation16_spill]] %s1278_s29 }
  0x16   : > { %189 = sbr.rel (%p1510_p12) target bundleno = 99 (0x63), region = 16 }
  0x1b   : > { %192 = sbr.rel (!%p1261_p4) target bundleno = 51 (0x33), region = 20  ;;  %s193_s5 = sand.u32 (%p1261_p4), 1, %s1167_s17  }
  0x1c   : > { %s877_s6 = sshll.u32 (%p1261_p4), %s1175_s19, 1  ;;  %s915_s7 = smul.u32 (%p1261_p4), 80, %s193_s5 }
  0x1d   : > { %s200_s8 = ssub.s32 (%p1261_p4), 3, %s877_s6  ;;  %s1297_s11 = scalar_lea.sflag (%p1261_p4), [#allocation3], %s193_s5 }
  0x1e   : > { %p201_p13 = scmp.lt.s32.totalorder (%p1261_p4), %s200_s8, 2  ;;  %s197_s12 = scalar_lea.vmem (%p1261_p4), [#allocation2], %s915_s7 }
  0x20   : > { %s1530_s8 = smov (!%p201_p13, %s200_s8), 2 }
  0x21   : > { %s1294_s9 = smul.u32 640, %s1530_s8 }
  0x23   : > { %s205_s10 = ssub.s32 1280, %s1294_s9 }
  0x24   : > { %206 = vsyncadd %s1297_s11, %s205_s10  ;;  %p878_p0 = scmp.ne.s32.totalorder %s1294_s9, 0  ;;  %s910_s13 = sshll.u32 %s1175_s19, 8 }
  0x25   : > { %s211_s24 = scalar_lea.hbm %s1504_s0, %s910_s13  ;;  %s880_s26 = sshll.u32 %s1530_s8, 3 }
  0x26   : > { %s214_s6 = sshll.u32 %s197_s12, 4  ;;  %s1181_s5 = smov [#allocation2]   ;;  %s215_s6 = int_to_ptr.vmem [resolvable:$true] %s214_s6 }
  0x27   : > { %s999_s23 = scalar_lea.vmem %s215_s6, %s1294_s9  ;;  %s1003_s7 = sshll.u32 %s1181_s5, 4  ;;  %s1004_s7 = int_to_ptr.vmem [resolvable:$false] %s1003_s7 }
  0x28   : > { %p1000_p1 = scmp.ne.s32.totalorder %s215_s6, %s999_s23  ;;  %s1005_s10 = scalar_lea.vmem %s1004_s7, 2560 }
  0x29   : > { %p1006_p5 = scmp.lt.s32.totalorder %s215_s6, %s1004_s7  ;;  %p1007_p6 = scmp.lt.s32.totalorder %s1005_s10, %s999_s23 }
  0x2a   : > { %p1001_p2 = pnand %p1000_p1, %p878_p0 }
  0x2b   : > { %p1008_p7 = por %p1007_p6, %p1006_p5 }
  0x2c   : > { %p1002_p3 = pneg %p1001_p2 }
  0x2e   : > { %p1009_p10 = pnand %p1008_p7, %p1002_p3 }
  0x30   : > { %1012 = shalt.err (!%p1009_p10)
}
  0x31   : > { %s1182_s29 = smov 384   ;;  %s1183_s8 = smov 256  }
  0x32   : > { %220 = dma.hbm_to_vmem [thread:$0]  (%p878_p0), %s211_s24, %s1294_s9, %s215_s6, %s1297_s11, %s1182_s29, %s1183_s8, %s880_s26  }
  0x33 PF: > { %223 = sbr.rel (!%p1261_p4) target bundleno = 75 (0x4b), region = 24  ;;  %s224_s12 = sand.u32 (%p1261_p4), 1, %s1179_s20  }
  0x34   : > { %s226_s13 = sand.u32 (%p1261_p4), 1, %s1167_s17   ;;  %s883_s14 = sshll.u32 (%p1261_p4), %s1175_s19, 1 }
  0x35   : > { %s916_s23 = smul.u32 (%p1261_p4), 80, %s226_s13  ;;  %s231_s22 = ssub.s32 (%p1261_p4), 3, %s883_s14 }
  0x36   : > { %p232_p13 = scmp.lt.s32.totalorder (%p1261_p4), %s231_s22, 2  ;;  %s1324_s9 = scalar_lea.sflag (%p1261_p4), [#allocation6], %s224_s12 }
  0x37   : > { %s228_s11 = scalar_lea.vmem (%p1261_p4), [#allocation5], %s916_s23 }
  0x38   : > { %s1532_s22 = smov (!%p232_p13, %s231_s22), 2 }
  0x39   : > { %s1321_s5 = smul.u32 640, %s1532_s22 }
  0x3b   : > { %s236_s29 = ssub.s32 1280, %s1321_s5 }
  0x3c   : > { %237 = vsyncadd %s1324_s9, %s236_s29  ;;  %p884_p0 = scmp.ne.s32.totalorder %s1321_s5, 0  ;;  %s911_s24 = sshll.u32 %s1175_s19, 8 }
  0x3d   : > { %s242_s7 = scalar_lea.hbm %s1505_s1, %s911_s24  ;;  %s886_s10 = sshll.u32 %s1532_s22, 3 }
  0x3e   : > { %s245_s8 = sshll.u32 %s228_s11, 4  ;;  %s1184_s12 = smov [#allocation5]   ;;  %s246_s8 = int_to_ptr.vmem [resolvable:$true] %s245_s8 }
  0x3f   : > { %s1025_s13 = scalar_lea.vmem %s246_s8, %s1321_s5  ;;  %s1029_s23 = sshll.u32 %s1184_s12, 4  ;;  %s1030_s23 = int_to_ptr.vmem [resolvable:$false] %s1029_s23 }
  0x40   : > { %p1026_p1 = scmp.ne.s32.totalorder %s246_s8, %s1025_s13  ;;  %s1031_s14 = scalar_lea.vmem %s1030_s23, 2560 }
  0x41   : > { %p1032_p5 = scmp.lt.s32.totalorder %s246_s8, %s1030_s23  ;;  %p1033_p6 = scmp.lt.s32.totalorder %s1031_s14, %s1025_s13 }
  0x42   : > { %p1027_p2 = pnand %p1026_p1, %p884_p0 }
  0x43   : > { %p1034_p7 = por %p1033_p6, %p1032_p5 }
  0x44   : > { %p1028_p3 = pneg %p1027_p2 }
  0x46   : > { %p1035_p10 = pnand %p1034_p7, %p1028_p3 }
  0x48   : > { %1038 = shalt.err (!%p1035_p10)
}
  0x49   : > { %s1185_s29 = smov 384   ;;  %s1186_s22 = smov 256  }
  0x4a   : > { %251 = dma.hbm_to_vmem [thread:$0]  (%p884_p0), %s242_s7, %s1321_s5, %s246_s8, %s1324_s9, %s1185_s29, %s1186_s22, %s886_s10  }
  0x4b PF: > { %254 = sbr.rel (!%p1261_p4) target bundleno = 99 (0x63), region = 28  ;;  %s255_s11 = sand.u32 (%p1261_p4), 1, %s1179_s20  }
  0x4c   : > { %s257_s24 = sand.u32 (%p1261_p4), 1, %s1167_s17   ;;  %s889_s6 = sshll.u32 (%p1261_p4), %s1175_s19, 1 }
  0x4d   : > { %s917_s26 = smul.u32 (%p1261_p4), 80, %s257_s24  ;;  %s262_s13 = ssub.s32 (%p1261_p4), 3, %s889_s6 }
  0x4e   : > { %p263_p13 = scmp.lt.s32.totalorder (%p1261_p4), %s262_s13, 2  ;;  %s1351_s9 = scalar_lea.sflag (%p1261_p4), [#allocation6], %s255_s11 }
  0x4f   : > { %s259_s25 = scalar_lea.vmem (%p1261_p4), [#allocation7], %s917_s26 }
  0x50   : > { %s1534_s13 = smov (!%p263_p13, %s262_s13), 2 }
  0x51   : > { %s1348_s12 = smul.u32 640, %s1534_s13 }
  0x53   : > { %s267_s5 = ssub.s32 1280, %s1348_s12 }
  0x54   : > { %268 = vsyncadd %s1351_s9, %s267_s5  ;;  %p890_p4 = scmp.ne.s32.totalorder %s1348_s12, 0  ;;  %s912_s7 = sshll.u32 %s1175_s19, 8 }
  0x55   : > { %s273_s23 = scalar_lea.hbm %s1506_s2, %s912_s7  ;;  %s892_s14 = sshll.u32 %s1534_s13, 3 }
  0x56   : > { %s276_s29 = sshll.u32 %s259_s25, 4  ;;  %s1187_s11 = smov [#allocation7]   ;;  %s277_s29 = int_to_ptr.vmem [resolvable:$true] %s276_s29 }
  0x57   : > { %s1051_s22 = scalar_lea.vmem %s277_s29, %s1348_s12  ;;  %s1055_s24 = sshll.u32 %s1187_s11, 4  ;;  %s1056_s24 = int_to_ptr.vmem [resolvable:$false] %s1055_s24 }
  0x58   : > { %p1052_p0 = scmp.ne.s32.totalorder %s277_s29, %s1051_s22  ;;  %s1057_s26 = scalar_lea.vmem %s1056_s24, 2560 }
  0x59   : > { %p1058_p3 = scmp.lt.s32.totalorder %s277_s29, %s1056_s24  ;;  %p1059_p5 = scmp.lt.s32.totalorder %s1057_s26, %s1051_s22 }
  0x5a   : > { %p1053_p1 = pnand %p1052_p0, %p890_p4 }
  0x5b   : > { %p1060_p6 = por %p1059_p5, %p1058_p3 }
  0x5c   : > { %p1054_p2 = pneg %p1053_p1 }
  0x5e   : > { %p1061_p7 = pnand %p1060_p6, %p1054_p2 }
  0x60   : > { %1064 = shalt.err (!%p1061_p7)
}
  0x61   : > { %s1188_s6 = smov 384   ;;  %s1189_s13 = smov 256  }
  0x62   : > { %282 = dma.hbm_to_vmem [thread:$0]  (%p890_p4), %s273_s23, %s1348_s12, %s277_s29, %s1351_s9, %s1188_s6, %s1189_s13, %s892_s14  }
  0x63 PF: > { %p895_p10 = scmp.ge.s32.totalorder %s1179_s20, 1  ;;  %p284_p13 = scmp.lt.s32.totalorder %s1179_s20, 3 }
  0x65   : > { %p285_p0 = pnand %p895_p10, %p284_p13 }
  0x66   : > { %s1370_s5 = sand.u32 (!%p285_p0), 1, %s1163_s16  }
  0x67   : > { %288 = sbr.rel (%p285_p0) target bundleno = 237 (0xed), region = 32  ;;  %s291_s7 = scalar_lea.sflag (!%p285_p0), [#allocation3], %s1370_s5 }
  0x68   : > { %s1373_s25 = smul.u32 (!%p285_p0), 80, %s1370_s5 }
  0x6a   : > { %s294_s10 = scalar_lea.vmem (!%p285_p0), [#allocation2], %s1373_s25 }
  0x6c   : > { %1142 = dma.done.wait (%p1269_p8), %s291_s7, 1280  }
  0x6d   : > { %1144 = vsyncadd (%p1269_p8), %s291_s7, 4294966016  ;;  %s299_s12 = sand.u32 1, %s1249_s21   ;;  %s303_s8 = scalar_lea.vmem [#allocation5], %s1373_s25 }
  0x6e   : > { %s300_s9 = scalar_lea.sflag [#allocation6], %s299_s12 }
  0x6f   : > { %1146 = dma.done.wait (%p1269_p8), %s300_s9, 2560  }
  0x70   : > { %1148 = vsyncadd (%p1269_p8), %s300_s9, 4294964736  ;;  %v380_v0 = vld [vmem:[%s294_s10] sm:$0xff]  ;;  %v381_v1 = vld [vmem:[%s294_s10 + $0x8] sm:$0xff]  ;;  %s312_s21 = scalar_lea.vmem [#allocation7], %s1373_s25  ;;  %s896_s27 = sshll.u32 %s1370_s5, 1 }
  0x71   : > { %v382_v2 = vld [vmem:[%s294_s10 + $0x10] sm:$0xff]  ;;  %v383_v3 = vld [vmem:[%s294_s10 + $0x18] sm:$0xff]  ;;  %v384_v4 = vld [vmem:[%s294_s10 + $0x20] sm:$0xff]  ;;  %s1399_s23 = scalar_lea.vmem [#allocation8], %s896_s27  ;;  %s1412_s14 = scalar_lea.vmem [#allocation9], %s896_s27 }
  0x72   : > { %v385_v5 = vld [vmem:[%s294_s10 + $0x28] sm:$0xff]  ;;  %v386_v6 = vld [vmem:[%s294_s10 + $0x30] sm:$0xff]  ;;  %v387_v7 = vld [vmem:[%s294_s10 + $0x38] sm:$0xff]  ;;  %s668_s29 = scalar_lea.sflag [#allocation4], %s1370_s5  ;;  %s673_s22 = scalar_lea.sflag [#allocation10], %s1370_s5 }
  0x73   : > { %v388_v8 = vld [vmem:[%s294_s10 + $0x40] sm:$0xff]  ;;  %v389_v9 = vld [vmem:[%s294_s10 + $0x48] sm:$0xff]  ;;  %v392_v12 = vld [vmem:[%s303_s8 + $0x10] sm:$0xff]  ;;  %s900_s11 = sshll.u32 (%p1273_p9), %s1171_s18, 1 }
  0x74   : > { %v390_v10 = vld [vmem:[%s303_s8] sm:$0xff]  ;;  %v391_v11 = vld [vmem:[%s303_s8 + $0x8] sm:$0xff]  ;;  %v393_v13 = vld [vmem:[%s303_s8 + $0x18] sm:$0xff]  ;;  %v412_v23 = vsub.f32 %v382_v2, %v392_v12  ;;  %s681_s24 = ssub.s32 (%p1273_p9), 3, %s900_s11 }
  0x75   : > { %v394_v14 = vld [vmem:[%s303_s8 + $0x20] sm:$0xff]  ;;  %v395_v15 = vld [vmem:[%s303_s8 + $0x28] sm:$0xff]  ;;  %v396_v16 = vld [vmem:[%s303_s8 + $0x30] sm:$0xff]  ;;  %v410_v18 = vsub.f32 %v380_v0, %v390_v10  ;;  %v411_v19 = vsub.f32 %v381_v1, %v391_v11  ;;  %v413_v24 = vsub.f32 %v383_v3, %v393_v13  ;;  %p682_p8 = scmp.lt.s32.totalorder (%p1273_p9), %s681_s24, 2 }
  0x76   : > { %v397_v17 = vld [vmem:[%s303_s8 + $0x38] sm:$0xff]  ;;  %v398_v20 = vld [vmem:[%s303_s8 + $0x40] sm:$0xff]  ;;  %v399_v21 = vld [vmem:[%s303_s8 + $0x48] sm:$0xff]  ;;  %v414_v25 = vsub.f32 %v384_v4, %v394_v14  ;;  %v415_v26 = vsub.f32 %v385_v5, %v395_v15  ;;  %v416_v30 = vsub.f32 %v386_v6, %v396_v16 }
  0x77   : > { %v400_v22 = vld [vmem:[%s312_s21] sm:$0xff]  ;;  %v401_v27 = vld [vmem:[%s312_s21 + $0x8] sm:$0xff]  ;;  %v402_v28 = vld [vmem:[%s312_s21 + $0x10] sm:$0xff]  ;;  %v417_v31 = vsub.f32 %v387_v7, %v397_v17  ;;  %v418_v32 = vsub.f32 %v388_v8, %v398_v20  ;;  %v419_v37 = vsub.f32 %v389_v9, %v399_v21 }
  0x78   : > { %v403_v29 = vld [vmem:[%s312_s21 + $0x18] sm:$0xff]  ;;  %v420_v33 = vsub.f32 %v380_v0, %v400_v22  ;;  %v404_v34 = vld [vmem:[%s312_s21 + $0x20] sm:$0xff]  ;;  %v405_v35 = vld [vmem:[%s312_s21 + $0x28] sm:$0xff]  ;;  %v421_v38 = vsub.f32 %v381_v1, %v401_v27  ;;  %v422_v39 = vsub.f32 %v382_v2, %v402_v28  ;;  %v1190_v28 = vmov 1966171168  }
  0x79   : > { %v406_v36 = vld [vmem:[%s312_s21 + $0x30] sm:$0xff]  ;;  %v423_v40 = vsub.f32 %v383_v3, %v403_v29  ;;  %v407_v41 = vld [vmem:[%s312_s21 + $0x38] sm:$0xff]  ;;  %v408_v42 = vld [vmem:[%s312_s21 + $0x40] sm:$0xff]  ;;  %v424_v44 = vsub.f32 %v384_v4, %v404_v34  ;;  %v425_v45 = vsub.f32 %v385_v5, %v405_v35  ;;  %v552_v29 = vunpack.c.l.s4 %v1190_v28 }
  0x7a   : > { %v409_v43 = vld [vmem:[%s312_s21 + $0x48] sm:$0xff]  ;;  %v426_v46 = vsub.f32 %v386_v6, %v406_v36  ;;  %v430_v47 = vadd.f32 %v420_v33, %v410_v18  ;;  %v427_v48 = vsub.f32 %v387_v7, %v407_v41  ;;  %v428_v49 = vsub.f32 %v388_v8, %v408_v42 }
  0x7b   : > { %v429_v50 = vsub.f32 %v389_v9, %v409_v43  ;;  %v431_v51 = vadd.f32 %v421_v38, %v411_v19  ;;  %v432_v52 = vadd.f32 %v422_v39, %v412_v23  ;;  %v433_v53 = vadd.f32 %v423_v40, %v413_v24 }
  0x7c   : > { %v434_v54 = vadd.f32 %v424_v44, %v414_v25  ;;  %v435_v55 = vadd.f32 %v425_v45, %v415_v26  ;;  %v436_v56 = vadd.f32 %v426_v46, %v416_v30  ;;  %v437_v57 = vadd.f32 %v427_v48, %v417_v31 }
  0x7d   : > { %v438_v58 = vadd.f32 %v428_v49, %v418_v32  ;;  %v439_v59 = vadd.f32 %v429_v50, %v419_v37  ;;  %v440_v60 = vsub.f32 %v410_v18, %v420_v33  ;;  %v441_v61 = vsub.f32 %v411_v19, %v421_v38 }
  0x7e   : > { %v442_v62 = vsub.f32 %v412_v23, %v422_v39  ;;  %v443_v63 = vsub.f32 %v413_v24, %v423_v40  ;;  %v444_v0 = vsub.f32 %v414_v25, %v424_v44  ;;  %v445_v1 = vsub.f32 %v415_v26, %v425_v45 }
  0x7f   : > { %v446_v2 = vsub.f32 %v416_v30, %v426_v46  ;;  %v447_v3 = vsub.f32 %v417_v31, %v427_v48  ;;  %v448_v4 = vsub.f32 %v418_v32, %v428_v49  ;;  %v449_v5 = vsub.f32 %v419_v37, %v429_v50 }
  0x80   : > { %v450_v6 = vmul.f32 %v440_v60, %v430_v47  ;;  %v451_v7 = vmul.f32 %v441_v61, %v431_v51  ;;  %v452_v8 = vmul.f32 %v442_v62, %v432_v52  ;;  %v453_v9 = vmul.f32 %v443_v63, %v433_v53 }
  0x81   : > { %v454_v10 = vmul.f32 %v444_v0, %v434_v54  ;;  %v455_v11 = vmul.f32 %v445_v1, %v435_v55  ;;  %v456_v12 = vmul.f32 %v446_v2, %v436_v56  ;;  %v457_v13 = vmul.f32 %v447_v3, %v437_v57 }
  0x82   : > { %v458_v14 = vmul.f32 %v448_v4, %v438_v58  ;;  %v459_v15 = vmul.f32 %v449_v5, %v439_v59  ;;  %v460_v30 = vlaneseq  ;;  %v553_v35 = vunpack.c.0.s8 %v552_v29 }
  0x83   : > { %v466_v16 = vmax.f32 %v450_v6, %v454_v10  ;;  %v476_v17 = vmax.f32 %v451_v7, %v455_v11  ;;  %v467_v18 = vmax.f32 %v452_v8, %v456_v12  ;;  %v477_v19 = vmax.f32 %v453_v9, %v457_v13 }
  0x84   : > { %v461_v36 = vshrl.u32 %v460_v30, 7  ;;  %vm1391_vm0 = vcmp.lt.s32.totalorder %v460_v30, 256 }
  0x85   : > { %v468_v20 = vmax.f32 %v466_v16, %v458_v14  ;;  %v478_v21 = vmax.f32 %v476_v17, %v459_v15 }
  0x86   : > { %v1388_v41 = vsub.s32 %v553_v35, %v461_v36  ;;  %v462_v43 = vadd.s32 8, %v461_v36  ;;  %v463_v44 = vadd.s32 16, %v461_v36  ;;  %v464_v45 = vadd.s32 24, %v461_v36 }
  0x87   : > { %v469_v22 = vmax.f32 %v468_v20, %v467_v18  ;;  %v479_v23 = vmax.f32 %v478_v21, %v477_v19  ;;  %v465_v47 = vadd.s32 32, %v461_v36 }
  0x89   : > { %v470_v24 = vrot.slane %v469_v22, 4  ;;  %v480_v25 = vrot.slane %v479_v23, 4 }
  0x8b   : > { %v471_v26 = vmax.f32 %v469_v22, %v470_v24  ;;  %v481_v27 = vmax.f32 %v479_v23, %v480_v25 }
  0x8d   : > { %v472_v31 = vrot.slane %v471_v26, 2  ;;  %v482_v32 = vrot.slane %v481_v27, 2 }
  0x8f   : > { %v473_v33 = vmax.f32 %v471_v26, %v472_v31  ;;  %v483_v34 = vmax.f32 %v481_v27, %v482_v32 }
  0x91   : > { %v474_v37 = vrot.slane %v473_v33, 1  ;;  %v484_v38 = vrot.slane %v483_v34, 1 }
  0x93   : > { %v475_v39 = vmax.f32 %v473_v33, %v474_v37  ;;  %v485_v40 = vmax.f32 %v483_v34, %v484_v38 }
  0x95   : > { %v550_v46 = vcombine.low %v475_v39, %v485_v40  ;;  %vm486_vm1 = vcmp.eq.f32.partialorder %v450_v6, %v475_v39  ;;  %vm487_vm2 = vcmp.eq.f32.partialorder %v451_v7, %v485_v40  ;;  %vm488_vm3 = vcmp.eq.f32.partialorder %v452_v8, %v475_v39 }
  0x96   : > { %vm489_vm4 = vcmp.eq.f32.partialorder %v453_v9, %v485_v40  ;;  %vm490_vm5 = vcmp.eq.f32.partialorder %v454_v10, %v475_v39  ;;  %vm491_vm6 = vcmp.eq.f32.partialorder %v455_v11, %v485_v40  ;;  %vm492_vm7 = vcmp.eq.f32.partialorder %v456_v12, %v475_v39 }
  0x97   : > { %v557_v48 = vrot.slane %v550_v46, %v1388_v41  ;;  %vm493_vm8 = vcmp.eq.f32.partialorder %v457_v13, %v485_v40  ;;  %vm494_vm9 = vcmp.eq.f32.partialorder %v458_v14, %v475_v39  ;;  %vm495_vm10 = vcmp.eq.f32.partialorder %v459_v15, %v485_v40 }
  0x98   : > { %v496_v49 = vsel %vm486_vm1, %v461_v36, 2147483647  ;;  %v497_v50 = vsel %vm487_vm2, %v461_v36, 2147483647  ;;  %v498_v51 = vsel %vm488_vm3, %v462_v43, 2147483647 }
  0x99   : > { %v564_v52 = vrot.slane %v557_v48, %v1388_v41  ;;  %v499_v53 = vsel %vm489_vm4, %v462_v43, 2147483647  ;;  %v500_v54 = vsel %vm490_vm5, %v463_v44, 2147483647  ;;  %v501_v55 = vsel %vm491_vm6, %v463_v44, 2147483647 }
  0x9a   : > { %v502_v56 = vsel %vm492_vm7, %v464_v45, 2147483647  ;;  %v503_v57 = vsel %vm493_vm8, %v464_v45, 2147483647  ;;  %v504_v58 = vsel %vm494_vm9, %v465_v47, 2147483647  ;;  %vm506_vm11 = vcmp.lt.s32.totalorder %v496_v49, %v500_v54 }
  0x9b   : > { %570 = vst.msk [vmem:[%s1399_s23] sm:$0x3] %vm1391_vm0, %v564_v52  ;;  %v505_v59 = vsel %vm495_vm10, %v465_v47, 2147483647  ;;  %v507_v60 = vsel %vm506_vm11, %v496_v49, %v500_v54  ;;  %vm508_vm12 = vcmp.lt.s32.totalorder %v498_v51, %v502_v56  ;;  %vm523_vm13 = vcmp.lt.s32.totalorder %v497_v50, %v501_v55 }
  0x9c   : > { %v509_v61 = vsel %vm508_vm12, %v498_v51, %v502_v56  ;;  %vm510_vm14 = vcmp.lt.s32.totalorder %v507_v60, %v504_v58  ;;  %v524_v62 = vsel %vm523_vm13, %v497_v50, %v501_v55  ;;  %vm525_vm15 = vcmp.lt.s32.totalorder %v499_v53, %v503_v57 }
  0x9d   : > { %v511_v63 = vsel %vm510_vm14, %v507_v60, %v504_v58  ;;  %v526_v0 = vsel %vm525_vm15, %v499_v53, %v503_v57  ;;  %vm527_vm1 = vcmp.lt.s32.totalorder %v524_v62, %v505_v59 }
  0x9e   : > { %vm512_vm2 = vcmp.lt.s32.totalorder %v511_v63, %v509_v61  ;;  %v528_v1 = vsel %vm527_vm1, %v524_v62, %v505_v59 }
  0x9f   : > { %v513_v2 = vsel %vm512_vm2, %v511_v63, %v509_v61  ;;  %vm529_vm3 = vcmp.lt.s32.totalorder %v528_v1, %v526_v0 }
  0xa0   : > { %v514_v3 = vrot.slane %v513_v2, 4  ;;  %v530_v4 = vsel %vm529_vm3, %v528_v1, %v526_v0 }
  0xa1   : > { %v531_v5 = vrot.slane %v530_v4, 4 }
  0xa2   : > { %v660_v6 = vld [vmem:[%s1399_s23] sm:$0x3]  ;;  %vm515_vm4 = vcmp.lt.s32.totalorder %v513_v2, %v514_v3 }
  0xa3   : > { %v661_v7 = vadd.f32 0.5, %v660_v6  ;;  %v516_v8 = vsel %vm515_vm4, %v513_v2, %v514_v3  ;;  %vm532_vm5 = vcmp.lt.s32.totalorder %v530_v4, %v531_v5 }
  0xa4   : > { %v517_v9 = vrot.slane %v516_v8, 2  ;;  %v533_v10 = vsel %vm532_vm5, %v530_v4, %v531_v5 }
  0xa5   : > { %666 = vst.msk [vmem:[%s1399_s23] sm:$0x3] %vm1391_vm0, %v661_v7  ;;  %v534_v11 = vrot.slane %v533_v10, 2 }
  0xa6   : > { %vm518_vm6 = vcmp.lt.s32.totalorder %v516_v8, %v517_v9 }
  0xa7   : > { %v519_v12 = vsel %vm518_vm6, %v516_v8, %v517_v9  ;;  %vm535_vm7 = vcmp.lt.s32.totalorder %v533_v10, %v534_v11 }
  0xa8   : > { %v520_v13 = vrot.slane %v519_v12, 1  ;;  %v536_v14 = vsel %vm535_vm7, %v533_v10, %v534_v11 }
  0xa9   : > { %v537_v15 = vrot.slane %v536_v14, 1 }
  0xaa   : > { %vm521_vm8 = vcmp.lt.s32.totalorder %v519_v12, %v520_v13 }
  0xab   : > { %v522_v16 = vsel %vm521_vm8, %v519_v12, %v520_v13  ;;  %vm538_vm9 = vcmp.lt.s32.totalorder %v536_v14, %v537_v15 }
  0xac   : > { %v539_v17 = vsel %vm538_vm9, %v536_v14, %v537_v15 }
  0xad   : > { %v571_v18 = vcombine.low %v522_v16, %v539_v17 }
  0xaf   : > { %v578_v19 = vrot.slane %v571_v18, %v1388_v41  ;;  %679 = sbr.rel (!%p1273_p9) target bundleno = 206 (0xce), region = 60 }
  0xb1   : > { %v585_v20 = vrot.slane %v578_v19, %v1388_v41 }
  0xb3   : > { %586 = vst.msk [vmem:[%s1412_s14] sm:$0x3] %vm1391_vm0, %v585_v20 }
  0xb4   : > { %s1536_s24 = smov (!%p682_p8, %s681_s24), 2 }
  0xb5   : > { %s1422_s26 = sshll.u32 %s1536_s24, 4 }
  0xb6   : > { %s686_s6 = ssub.s32 32, %s1422_s26 }
  0xb7   : > { %687 = vsyncadd %s668_s29, %s686_s6  ;;  %p902_p4 = scmp.ne.s32.totalorder %s1422_s26, 0  ;;  %s913_s13 = sshll.u32 %s1171_s18, 5 }
  0xb8   : > { %s690_s10 = scalar_lea.hbm %s1507_s3, %s913_s13  ;;  %s692_s12 = sshll.u32 %s1399_s23, 4  ;;  %s693_s12 = int_to_ptr.vmem [resolvable:$true] %s692_s12 }
  0xb9   : > { %s1065_s9 = scalar_lea.vmem %s693_s12, %s1422_s26  ;;  %s1191_s8 = smov [#allocation8]  }
  0xba   : > { %p1066_p1 = scmp.ne.s32.totalorder %s693_s12, %s1065_s9  ;;  %s1069_s21 = sshll.u32 %s1191_s8, 4  ;;  %s1070_s21 = int_to_ptr.vmem [resolvable:$false] %s1069_s21 }
  0xbb   : > { %s1071_s27 = scalar_lea.vmem %s1070_s21, 64  ;;  %p1072_p5 = scmp.lt.s32.totalorder %s693_s12, %s1070_s21 }
  0xbc   : > { %p1067_p2 = pnand %p1066_p1, %p902_p4  ;;  %p1073_p6 = scmp.lt.s32.totalorder %s1071_s27, %s1065_s9 }
  0xbe   : > { %p1068_p3 = pneg %p1067_p2  ;;  %p1074_p7 = por %p1073_p6, %p1072_p5 }
  0xc0   : > { %p1075_p10 = pnand %p1074_p7, %p1068_p3 }
  0xc2   : > { %1078 = shalt.err (!%p1075_p10)
}
  0xc3   : > { %s1079_s11 = scalar_lea.hbm %s690_s10, %s1422_s26  ;;  %s1083_s6 = scalar_lea.hbm %s1507_s3, 48 }
  0xc4   : > { %p1080_p13 = scmp.ne.s32.totalorder %s690_s10, %s1079_s11  ;;  %p1084_p1 = scmp.lt.s32.totalorder %s690_s10, %s1507_s3 }
  0xc5   : > { %p1085_p2 = scmp.lt.s32.totalorder %s1083_s6, %s1079_s11 }
  0xc6   : > { %p1081_p0 = pnand %p1080_p13, %p902_p4 }
  0xc7   : > { %p1086_p12 = por %p1085_p2, %p1084_p1 }
  0xc8   : > { %p1082_p8 = pneg %p1081_p0 }
  0xca   : > { %p1087_p5 = pnand %p1086_p12, %p1082_p8 }
  0xcc   : > { %1090 = shalt.err (!%p1087_p5)
}
  0xcd   : > { %695 = dma.vmem_to_hbm [thread:$0]  (%p902_p4), %s693_s12, %s1422_s26, %s690_s10, %s668_s29  }
  0xce PF: > { %698 = sbr.rel (!%p1273_p9) target bundleno = 237 (0xed), region = 64  ;;  %s904_s7 = sshll.u32 (%p1273_p9), %s1171_s18, 1 }
  0xcf   : > { %s700_s9 = ssub.s32 (%p1273_p9), 3, %s904_s7 }
  0xd0   : > { %p701_p3 = scmp.lt.s32.totalorder (%p1273_p9), %s700_s9, 2 }
  0xd3   : > { %s1538_s9 = smov (!%p701_p3, %s700_s9), 2 }
  0xd4   : > { %s1453_s8 = sshll.u32 %s1538_s9, 4 }
  0xd5   : > { %s705_s21 = ssub.s32 32, %s1453_s8 }
  0xd6   : > { %706 = vsyncadd %s673_s22, %s705_s21  ;;  %p906_p12 = scmp.ne.s32.totalorder %s1453_s8, 0  ;;  %s914_s28 = sshll.u32 %s1171_s18, 5 }
  0xd7   : > { %s709_s10 = scalar_lea.hbm %s1508_s4, %s914_s28  ;;  %s711_s12 = sshll.u32 %s1412_s14, 4  ;;  %s712_s12 = int_to_ptr.vmem [resolvable:$true] %s711_s12 }
  0xd8   : > { %s1091_s27 = scalar_lea.vmem %s712_s12, %s1453_s8  ;;  %s1192_s11 = smov [#allocation9]  }
  0xd9   : > { %p1092_p9 = scmp.ne.s32.totalorder %s712_s12, %s1091_s27  ;;  %s1095_s23 = sshll.u32 %s1192_s11, 4  ;;  %s1096_s23 = int_to_ptr.vmem [resolvable:$false] %s1095_s23 }
  0xda   : > { %s1097_s24 = scalar_lea.vmem %s1096_s23, 64  ;;  %p1098_p7 = scmp.lt.s32.totalorder %s712_s12, %s1096_s23 }
  0xdb   : > { %p1093_p4 = pnand %p1092_p9, %p906_p12  ;;  %p1099_p10 = scmp.lt.s32.totalorder %s1097_s24, %s1091_s27 }
  0xdd   : > { %p1094_p6 = pneg %p1093_p4  ;;  %p1100_p13 = por %p1099_p10, %p1098_p7 }
  0xdf   : > { %p1101_p0 = pnand %p1100_p13, %p1094_p6 }
  0xe1   : > { %1104 = shalt.err (!%p1101_p0)
}
  0xe2   : > { %s1105_s18 = scalar_lea.hbm %s709_s10, %s1453_s8  ;;  %s1109_s13 = scalar_lea.hbm %s1508_s4, 48 }
  0xe3   : > { %p1106_p8 = scmp.ne.s32.totalorder %s709_s10, %s1105_s18  ;;  %p1110_p5 = scmp.lt.s32.totalorder %s709_s10, %s1508_s4 }
  0xe4   : > { %p1111_p3 = scmp.lt.s32.totalorder %s1109_s13, %s1105_s18 }
  0xe5   : > { %p1107_p1 = pnand %p1106_p8, %p906_p12 }
  0xe6   : > { %p1112_p9 = por %p1111_p3, %p1110_p5 }
  0xe7   : > { %p1108_p2 = pneg %p1107_p1 }
  0xe9   : > { %p1113_p4 = pnand %p1112_p9, %p1108_p2 }
  0xeb   : > { %1116 = shalt.err (!%p1113_p4)
}
  0xec   : > { %714 = dma.vmem_to_hbm [thread:$0]  (%p906_p12), %s712_s12, %s1453_s8, %s709_s10, %s673_s22  }
  0xed PF: > { %s723_s9 = sand.u32 1, %s1159_s15   ;;  %p1519_p6 = scmp.ge.s32.totalorder %s1179_s20, 2 }
  0xee   : > { %s724_s21 = scalar_lea.sflag [#allocation4], %s723_s9 }
  0xef   : > { %p925_p7 = pnand %p1519_p6, %p1280_p11 }
  0xf1   : > { %p926_p10 = pneg %p925_p7 }
  0xf3   : > { %1150 = dma.done.wait (%p926_p10), %s724_s21, 32  }
  0xf4   : > { %1152 = vsyncadd (%p926_p10), %s724_s21, 4294967264  ;;  %s733_s28 = scalar_lea.sflag [#allocation10], %s723_s9 }
  0xf5   : > { %1154 = dma.done.wait (%p926_p10), %s733_s28, 32  }
  0xf6   : > { %1156 = vsyncadd (%p926_p10), %s733_s28, 4294967264  ;;  %s27_s20 = sadd.s32 1, %s1179_s20   ;;  %s1520_s5 = sld [smem:[#allocation16_spill]] }
  0xf7   : > { %p24_p13 = scmp.ge.s32.totalorder %s27_s20, 4   ;;  %s1521_s22 = sld [smem:[#allocation15_spill]] }
  0xf8   : > { %s1522_s15 = smov %s1163_s16  ;;  %s1523_s16 = smov %s1167_s17 }
  0xf9   : > { %s1525_s18 = smov %s1175_s19  ;;  %26 = sbr.rel (!%p24_p13) target bundleno = 10 (0xa), region = 130 }
  0xfc   : > { %s1524_s17 = smov %s1520_s5 }
  0xfd   : > { %s1526_s19 = smov %s1521_s22 }
  0xfe   :  { %738 = vsyncpa [#allocation3], 1 }
  0xff   :  { %740 = vsyncpa [#allocation3 + $0x1], 1 }
 0x100   :  { %741 = vsyncpa [#allocation6], 1 }
 0x101   :  { %743 = vsyncpa [#allocation6 + $0x1], 1 }
 0x102   :  { %744 = vsyncpa [#allocation4], 1 }
 0x103   :  { %746 = vsyncpa [#allocation4 + $0x1], 1 }
 0x104   :  { %747 = vsyncpa [#allocation10], 1 }
 0x105   :  { %749 = vsyncpa [#allocation10 + $0x1], 1 }

</bundles_post_ra>
